<compile_context>
chip_gen: v5e
topology: v5e:2x2
jax: 0.10.0
libtpu: 0.0.40
codegen_flags: <defaults>
</compile_context>

<pallas_src>
from functools import partial

import jax
import jax.numpy as jnp
from jax.experimental import pallas as pl
from jax.experimental.pallas import tpu as pltpu


# ---------------------------------------------------------------------------
# helpers
# ---------------------------------------------------------------------------
def _round_up(x, m):
    return ((x + m - 1) // m) * m


def _pick_tile(dim, max_tile):
    """Largest multiple of 128 that divides `dim` (a multiple of 128) and is <= max_tile."""
    best = 128
    t = 128
    while t <= min(dim, max_tile):
        if dim % t == 0:
            best = t
        t += 128
    return best


# ---------------------------------------------------------------------------
# Kernel 1: fused Linear (bias-free) + optional BatchNorm1d(affine=False) + ReLU
# ---------------------------------------------------------------------------
def _linear_bn_act_kernel(x_ref, w_ref, o_ref, acc_ref, *,
                          apply_bn, relu, eps, true_b, b_pad):
    k = pl.program_id(1)

    @pl.when(k == 0)
    def _():
        acc_ref[...] = jnp.zeros_like(acc_ref)

    # MXU matmul: bf16 operands, f32 accumulation.
    acc_ref[...] += jnp.dot(x_ref[...], w_ref[...],
                            preferred_element_type=jnp.float32)

    @pl.when(k == pl.num_programs(1) - 1)
    def _():
        y = acc_ref[...]
        if apply_bn:
            # Batch statistics over the *true* batch.  Padded batch rows are exact
            # zeros (zero input rows x bias-free linear), so plain sums / true_b are
            # exact means over the real rows.  Biased variance, as in torch BN.
            inv_b = 1.0 / float(true_b)
            mean = jnp.sum(y, axis=0, keepdims=True) * inv_b
            var = jnp.sum(y * y, axis=0, keepdims=True) * inv_b - mean * mean
            var = jnp.maximum(var, 0.0)          # guard E[y^2]-E[y]^2 cancellation
            y = (y - mean) * jax.lax.rsqrt(var + eps)
        if relu:
            y = jnp.maximum(y, 0.0)
        if apply_bn and b_pad > true_b:
            # BN makes padded rows nonzero; re-zero them so they stay inert downstream.
            row = jax.lax.broadcasted_iota(jnp.int32, y.shape, 0)
            y = jnp.where(row < true_b, y, 0.0)
        o_ref[...] = y.astype(o_ref.dtype)


def linear_bn_act(x, w, *, apply_bn, relu, true_b, eps=1e-5,
                  max_tile=512, compute_dtype=jnp.bfloat16,
                  out_dtype=jnp.bfloat16):
    """y = relu?(bn?(x @ w)) with bias-free linear, batch-stat BN (affine=False).

    `x` may already be zero-padded to (b_pad, k_pad) in bf16 (output of a previous
    layer); in that case no cast/pad/slice XLA passes are emitted.  Output is the
    padded (b_pad, n_pad) bf16 activation (padded rows/cols are exact zeros).
    """
    b_in, k_in = x.shape
    k, n = w.shape

    b_pad = _round_up(true_b, 16)      # bf16 vregs pack (16, 128)
    k_pad = _round_up(k, 128)
    n_pad = _round_up(n, 128)
    assert b_in in (true_b, b_pad), (b_in, true_b, b_pad)
    assert k_in in (k, k_pad), (k_in, k, k_pad)

    xp = x if x.dtype == compute_dtype else x.astype(compute_dtype)
    if xp.shape != (b_pad, k_pad):
        xp = jnp.pad(xp, ((0, b_pad - b_in), (0, k_pad - k_in)))
    wp = w if w.dtype == compute_dtype else w.astype(compute_dtype)
    if wp.shape != (k_pad, n_pad):
        wp = jnp.pad(wp, ((0, k_pad - k), (0, n_pad - n)))

    tk = _pick_tile(k_pad, max_tile)
    # Keep >=2 steps on the parallel N axis whenever possible (v7x megacore).
    tn = _pick_tile(n_pad, min(max_tile, max(128, n_pad // 2)))
    grid = (n_pad // tn, k_pad // tk)

    out = pl.pallas_call(
        partial(_linear_bn_act_kernel, apply_bn=apply_bn, relu=relu,
                eps=float(eps), true_b=int(true_b), b_pad=int(b_pad)),
        out_shape=jax.ShapeDtypeStruct((b_pad, n_pad), out_dtype),
        grid_spec=pltpu.PrefetchScalarGridSpec(
            num_scalar_prefetch=0,
            grid=grid,
            in_specs=[
                pl.BlockSpec((b_pad, tk), lambda j, kk: (0, kk)),   # activations
                pl.BlockSpec((tk, tn), lambda j, kk: (kk, j)),      # weights
            ],
            out_specs=pl.BlockSpec((b_pad, tn), lambda j, kk: (0, j)),
            scratch_shapes=[pltpu.VMEM((b_pad, tn), jnp.float32)],
        ),
        compiler_params=pltpu.CompilerParams(
            dimension_semantics=("parallel", "arbitrary"),
            vmem_limit_bytes=32 * 1024 * 1024,
        ),
    )(xp, wp)
    return out   # padded (b_pad, n_pad), bf16


# ---------------------------------------------------------------------------
# Kernel 2: cross-correlation + Barlow Twins loss
#   c = bn(z1).T @ bn(z2) / B
#   loss = sum((diag(c)-1)^2) + lamda * sum(offdiag(c)^2)
#        = lamda * sum(c^2)   + sum_diag((c-1)^2 - lamda*c^2)
# ---------------------------------------------------------------------------
def _bt_loss_kernel(z1_ref, z2_ref, o_ref, acc_ref, *,
                    inv_b, lamda, d_true, tile_d):
    i = pl.program_id(0)
    j = pl.program_id(1)

    @pl.when(j == 0)
    def _():
        acc_ref[...] = jnp.zeros_like(acc_ref)

    # (tile_d, tile_d) tile of c: contract bf16 blocks over the batch (sublane) axis,
    # no wrapper transpose.  Padded batch rows are exact zeros.
    c = jax.lax.dot_general(
        z1_ref[...], z2_ref[...],
        dimension_numbers=(((0,), (0,)), ((), ())),
        preferred_element_type=jnp.float32) * inv_b

    # Off-diagonal-style term for every tile.
    acc_ref[...] += lamda * jnp.sum(c * c, axis=0, keepdims=True)

    # Diagonal correction only on the D/td diagonal tiles (skips the iota/select
    # epilogue on all off-diagonal tiles).  Padded feature indices are masked out.
    @pl.when(i == j)
    def _():
        row = jax.lax.broadcasted_iota(jnp.int32, c.shape, 0)
        col = jax.lax.broadcasted_iota(jnp.int32, c.shape, 1)
        is_diag = (row == col) & (row + i * tile_d < d_true)
        corr = jnp.where(is_diag, (c - 1.0) * (c - 1.0) - lamda * (c * c), 0.0)
        acc_ref[...] += jnp.sum(corr, axis=0, keepdims=True)

    @pl.when(j == pl.num_programs(1) - 1)
    def _():
        # Emit this row-tile's partials as a lane-dense (8, tile_d) block (row 0 holds
        # the data, rows 1..7 are zeros) so the i axis can be megacore-parallel.
        rows = jax.lax.broadcasted_iota(jnp.int32, (8, tile_d), 0)
        o_ref[...] = jnp.where(rows == 0,
                               jnp.broadcast_to(acc_ref[...], (8, tile_d)),
                               0.0)


def barlow_twins_loss(z1n, z2n, *, batch, d_true, lamda, max_tile=512):
    """z1n / z2n: bn-normalized, zero-padded (b_pad, d_pad) bf16 activations."""
    b_pad, d_pad = z1n.shape
    assert z2n.shape == (b_pad, d_pad)

    # Keep >=2 steps on the parallel i axis whenever possible (v7x megacore).
    td = _pick_tile(d_pad, min(max_tile, max(128, d_pad // 2)))
    num_i = d_pad // td
    grid = (num_i, d_pad // td)

    out = pl.pallas_call(
        partial(_bt_loss_kernel, inv_b=1.0 / float(batch),
                lamda=float(lamda), d_true=int(d_true), tile_d=int(td)),
        out_shape=jax.ShapeDtypeStruct((num_i * 8, td), jnp.float32),
        grid_spec=pltpu.PrefetchScalarGridSpec(
            num_scalar_prefetch=0,
            grid=grid,
            in_specs=[
                pl.BlockSpec((b_pad, td), lambda i, j: (0, i)),  # -> rows of c tile
                pl.BlockSpec((b_pad, td), lambda i, j: (0, j)),  # -> cols of c tile
            ],
            out_specs=pl.BlockSpec((8, td), lambda i, j: (i, 0)),
            scratch_shapes=[pltpu.VMEM((1, td), jnp.float32)],
        ),
        compiler_params=pltpu.CompilerParams(
            dimension_semantics=("parallel", "arbitrary"),
            vmem_limit_bytes=32 * 1024 * 1024,
        ),
    )(z1n, z2n)
    return jnp.sum(out)   # tiny (num_i*8, td) partial array; padded lanes are zero


# ---------------------------------------------------------------------------
# Modules (JAX ports of the PyTorch classes)
# ---------------------------------------------------------------------------
class BackboneStandIn:
    """Flatten + bias-free linear + ReLU feature extractor.

    # TODO(synk): the real backbone is an externally supplied pretrained video network
    # (e.g. torchvision S3D); that cannot be reproduced in-script, so this deterministic
    # stand-in produces (B, feature_size) features via the same fused Pallas kernel.
    """

    def __init__(self, in_dim, feature_size, *, key, param_dtype=jnp.bfloat16):
        self.w = (jax.random.normal(key, (in_dim, feature_size), jnp.float32)
                  / jnp.sqrt(float(in_dim))).astype(param_dtype)

    def __call__(self, x):
        b = x.shape[0]
        x = x.reshape(b, -1)
        # returns padded (b_pad, feat_pad) bf16; padded rows/cols are exact zeros
        return linear_bn_act(x, self.w, apply_bn=False, relu=True, true_b=b)


class Projector:
    """3-layer MLP: [Linear+BN+ReLU] x2 + Linear (all bias-free, BN affine=False)."""

    def __init__(self, in_dim, hidden_dim=512, out_dim=128, *, key,
                 param_dtype=jnp.bfloat16):
        k1, k2, k3 = jax.random.split(key, 3)

        def _init(k, fan_in, fan_out):
            return (jax.random.normal(k, (fan_in, fan_out), jnp.float32)
                    / jnp.sqrt(float(fan_in))).astype(param_dtype)

        self.w1 = _init(k1, in_dim, hidden_dim)
        self.w2 = _init(k2, hidden_dim, hidden_dim)
        self.w3 = _init(k3, hidden_dim, out_dim)

    def forward(self, x, *, true_b, fused_output_bn=False):
        # x is the padded bf16 backbone output; activations stay padded+bf16 between
        # layers (no cast/pad/slice round trips through HBM).
        h = linear_bn_act(x, self.w1, apply_bn=True, relu=True, true_b=true_b)
        h = linear_bn_act(h, self.w2, apply_bn=True, relu=True, true_b=true_b)
        # layer3 (plain linear); optionally fuse the loss-head BatchNorm here.
        z = linear_bn_act(h, self.w3, apply_bn=fused_output_bn, relu=False,
                          true_b=true_b)
        return z


class BarlowTwins:
    """Barlow Twins: loss = sum((diag(c)-1)^2) + lamda * sum(offdiag(c)^2)."""

    def __init__(self, backbone, feature_size, projection_dim=1024,
                 hidden_dim=1024, lamda=0.001, *, key, param_dtype=jnp.bfloat16):
        del feature_size  # projector in_dim is inferred from the backbone stand-in
        self.lamda = lamda
        self.projection_dim = projection_dim
        self.backbone = backbone
        self.projector = Projector(backbone.w.shape[1], hidden_dim, projection_dim,
                                   key=key, param_dtype=param_dtype)

    def forward(self, x1, x2):
        b = x1.shape[0]
        f1 = self.backbone(x1)
        f2 = self.backbone(x2)
        # encoder = backbone -> projector; the trailing BatchNorm1d(affine=False)
        # (`self.bn` in the PyTorch module) is fused into the last linear kernel,
        # so z1n/z2n are already bn(z1)/bn(z2) (padded bf16, padded entries = 0).
        z1n = self.projector.forward(f1, true_b=b, fused_output_bn=True)
        z2n = self.projector.forward(f2, true_b=b, fused_output_bn=True)
        return barlow_twins_loss(z1n, z2n, batch=b, d_true=self.projection_dim,
                                 lamda=self.lamda)


# ---------------------------------------------------------------------------
# pure-JAX reference (mirrors the kernel's bf16 streaming / f32 accumulation)
# ---------------------------------------------------------------------------
def _reference_loss(x1, x2, backbone, projector, lamda, eps=1e-5):
    def bn(y):
        mean = jnp.mean(y, axis=0, keepdims=True)
        var = jnp.maximum(jnp.mean(y * y, axis=0, keepdims=True) - mean * mean, 0.0)
        return (y - mean) / jnp.sqrt(var + eps)

    def dot(a, w):
        return jnp.dot(a.astype(jnp.bfloat16), w.astype(jnp.bfloat16),
                       preferred_element_type=jnp.float32)

    def encode(x):
        h = x.reshape(x.shape[0], -1)
        h = jnp.maximum(dot(h, backbone.w), 0.0)
        h = jnp.maximum(bn(dot(h, projector.w1)), 0.0)
        h = jnp.maximum(bn(dot(h, projector.w2)), 0.0)
        return dot(h, projector.w3)

    z1, z2 = encode(x1), encode(x2)
    z1n = bn(z1).astype(jnp.bfloat16)
    z2n = bn(z2).astype(jnp.bfloat16)
    c = jnp.dot(z1n.T, z2n, preferred_element_type=jnp.float32) / x1.shape[0]
    diag = jnp.diag(c)
    on = jnp.sum((diag - 1.0) ** 2)
    off = jnp.sum(c * c) - jnp.sum(diag * diag)
    return on + lamda * off


# ---------------------------------------------------------------------------
if __name__ == "__main__":
    key = jax.random.PRNGKey(0)
    kx1, kx2, kb, kp = jax.random.split(key, 4)

    # Two augmented video clips, NCTHW, small shapes (B deliberately not a multiple
    # of 8/16 to exercise the zero-padding + row re-masking path).
    B, C, T, H, W = 6, 3, 4, 16, 16
    x1 = jax.random.uniform(kx1, (B, C, T, H, W), dtype=jnp.float32)
    x2 = jax.random.uniform(kx2, (B, C, T, H, W), dtype=jnp.float32)

    feature_size, hidden_dim, projection_dim = 128, 256, 256
    backbone = BackboneStandIn(C * T * H * W, feature_size, key=kb)
    model = BarlowTwins(backbone, feature_size, projection_dim=projection_dim,
                        hidden_dim=hidden_dim, lamda=0.001, key=kp)

    loss = jax.block_until_ready(model.forward(x1, x2))
    ref = jax.block_until_ready(_reference_loss(x1, x2, backbone,
                                                model.projector, model.lamda))

    assert loss.shape == () and loss.dtype == jnp.float32
    assert bool(jnp.isfinite(loss))
    assert bool(jnp.allclose(loss, ref, rtol=2e-2, atol=2e-2)), (loss, ref)
    print("KERNEL_OK")
</pallas_src>

<mosaic_0001>
module attributes {stable_mosaic.version = 11 : i64} {
  func.func @_linear_bn_act_kernel(%arg0: i32, %arg1: i32, %arg2: memref<16x512xbf16, #tpu.memory_space<vmem>>, %arg3: memref<512x128xbf16, #tpu.memory_space<vmem>>, %arg4: memref<16x128xbf16, #tpu.memory_space<vmem>>, %arg5: memref<16x128xf32, #tpu.memory_space<vmem>>) attributes {dimension_semantics = [#tpu.dimension_semantics<parallel>, #tpu.dimension_semantics<arbitrary>], iteration_bounds = array<i64: 1, 6>, scalar_prefetch = 0 : i64, scratch_operands = 1 : i64, tpu.core_type = #tpu.core_type<tc>, window_params = [{transform_indices = @transform_0, window_bounds = array<i64: 16, 512>}, {transform_indices = @transform_1, window_bounds = array<i64: 512, 128>}, {transform_indices = @transform_2, window_bounds = array<i64: 16, 128>}]} {
    %c0_i32 = arith.constant 0 : i32
    %0 = arith.cmpi eq, %arg1, %c0_i32 : i32
    %1 = arith.extui %0 : i1 to i32
    %c0_i32_0 = arith.constant 0 : i32
    %2 = arith.cmpi ne, %1, %c0_i32_0 : i32
    scf.if %2 {
      %cst_9 = arith.constant 0.000000e+00 : f32
      %12 = vector.broadcast %cst_9 : f32 to vector<16x128xf32>
      %c0_10 = arith.constant 0 : index
      %c0_11 = arith.constant 0 : index
      %13 = vector.load %arg5[%c0_10, %c0_11] : memref<16x128xf32, #tpu.memory_space<vmem>>, vector<16x128xf32>
      tpu.vector_store %arg5[%c0_10, %c0_11], %12 {strides = array<i32>} : memref<16x128xf32, #tpu.memory_space<vmem>>, vector<16x128xf32>,
    } else {
    }
    %c0 = arith.constant 0 : index
    %c0_1 = arith.constant 0 : index
    %3 = vector.load %arg5[%c0, %c0_1] : memref<16x128xf32, #tpu.memory_space<vmem>>, vector<16x128xf32>
    %c0_2 = arith.constant 0 : index
    %c0_3 = arith.constant 0 : index
    %4 = vector.load %arg2[%c0_2, %c0_3] : memref<16x512xbf16, #tpu.memory_space<vmem>>, vector<16x512xbf16>
    %c0_4 = arith.constant 0 : index
    %c0_5 = arith.constant 0 : index
    %5 = vector.load %arg3[%c0_4, %c0_5] : memref<512x128xbf16, #tpu.memory_space<vmem>>, vector<512x128xbf16>
    %cst = arith.constant dense<0.000000e+00> : vector<16x128xf32>
    %6 = tpu.matmul %4, %5, %cst {dimension_numbers = #tpu.dot_dimension_numbers<[1], [0], [0], [1], [0, 0, 1, 1], [], []>} : vector<16x512xbf16>, vector<512x128xbf16>, vector<16x128xf32> -> vector<16x128xf32>
    %7 = arith.addf %3, %6 : vector<16x128xf32>
    %c0_6 = arith.constant 0 : index
    %c0_7 = arith.constant 0 : index
    %8 = vector.load %arg5[%c0_6, %c0_7] : memref<16x128xf32, #tpu.memory_space<vmem>>, vector<16x128xf32>
    tpu.vector_store %arg5[%c0_6, %c0_7], %7 {strides = array<i32>} : memref<16x128xf32, #tpu.memory_space<vmem>>, vector<16x128xf32>,
    %c5_i32 = arith.constant 5 : i32
    %9 = arith.cmpi eq, %arg1, %c5_i32 : i32
    %10 = arith.extui %9 : i1 to i32
    %c0_i32_8 = arith.constant 0 : i32
    %11 = arith.cmpi ne, %10, %c0_i32_8 : i32
    scf.if %11 {
      %c0_9 = arith.constant 0 : index
      %c0_10 = arith.constant 0 : index
      %12 = vector.load %arg5[%c0_9, %c0_10] : memref<16x128xf32, #tpu.memory_space<vmem>>, vector<16x128xf32>
      %cst_11 = arith.constant 0.000000e+00 : f32
      %13 = vector.broadcast %cst_11 : f32 to vector<16x128xf32>
      %14 = arith.maximumf %12, %13 : vector<16x128xf32>
      %15 = arith.truncf %14 : vector<16x128xf32> to vector<16x128xbf16>
      %c0_12 = arith.constant 0 : index
      %c0_13 = arith.constant 0 : index
      %16 = vector.load %arg4[%c0_12, %c0_13] : memref<16x128xbf16, #tpu.memory_space<vmem>>, vector<16x128xbf16>
      tpu.vector_store %arg4[%c0_12, %c0_13], %15 {strides = array<i32>} : memref<16x128xbf16, #tpu.memory_space<vmem>>, vector<16x128xbf16>,
    } else {
    }
    return
  }
  func.func @transform_0(%arg0: i32, %arg1: i32) -> (i32, i32) {
    %c0_i32 = arith.constant 0 : i32
    %c0_i32_0 = arith.constant 0 : i32
    return %c0_i32, %arg1 : i32, i32
  }
  func.func @transform_1(%arg0: i32, %arg1: i32) -> (i32, i32) {
    %c0_i32 = arith.constant 0 : i32
    return %arg1, %arg0 : i32, i32
  }
  func.func @transform_2(%arg0: i32, %arg1: i32) -> (i32, i32) {
    %c0_i32 = arith.constant 0 : i32
    %c0_i32_0 = arith.constant 0 : i32
    return %c0_i32, %arg0 : i32, i32
  }
}

</mosaic_0001>

<bundles_post_ra>
// kernel: tpu_custom_call.1
= control target key start
LH: loop header
LB: loop body
LE: loop exit
PB: predicated region body
PF: predicated region fallthrough
CT: control target
= control target key end

     0   :  { %7 = vsyncpa [#allocation4], 0  ;;  %s1285_s0 = inlined_call_operand.hbm [shape: bf16[16,3072], index: 0, kind: input, shape index: {}]   ;;  %s1286_s1 = inlined_call_operand.hbm [shape: bf16[3072,128], index: 1, kind: input, shape index: {}]   ;;  %s1287_s2 = inlined_call_operand.hbm [shape: bf16[16,128], index: 2, kind: output, shape index: {}]  }
   0x1   :  { %9 = vsyncpa [#allocation4 + $0x1], 0 }
   0x2   :  { %10 = vsyncpa [#allocation7], 0 }
   0x3   :  { %12 = vsyncpa [#allocation7 + $0x1], 0 }
   0x4   :  { %13 = vsyncpa [#allocation5], 0  ;;  %s1127_s9 = smov 0   ;;  %s1129_s10 = smov 0  }
   0x5   :  { %s1131_s11 = smov 0   ;;  %s1133_s12 = smov 0  }
   0x6   :  { %s1135_s13 = smov 0   ;;  %s1137_s14 = smov 0  }
   0x7 LB: > { %s675_s15 = sadd.s32 4294967295, %s1101_s14   ;;  %s28_s16 = sadd.s32 1, %s1097_s13  ;;  %s1101_s14 = sphi %s1137_s14, %s19_s14   ;;  %s1097_s13 = sphi %s1135_s13, %s1295_s13   ;;  %s1093_s12 = sphi %s1133_s12, %s1294_s12   ;;  %s1089_s11 = sphi %s1131_s11, %s1293_s11   ;;  %s1085_s10 = sphi %s1129_s10, %s1292_s10   ;;  %s1081_s9 = sphi %s1127_s9, %s1291_s9  }
   0x8   : > { %p29_p0 = scmp.ge.s32.totalorder %s28_s16, 6  ;;  %s38_s17 = sadd.s32 1, %s1089_s11 }
   0x9   : > { %p45_p1 = scmp.ne.s32.totalorder %s1089_s11, %s1085_s10  ;;  %p46_p2 = scmp.eq.s32.totalorder %s1101_s14, 0 }
   0xa   : > { %s1297_s16 = smov (%p29_p0, %s28_s16), 0  ;;  %p51_p4 = scmp.ne.s32.totalorder %s1085_s10, %s1081_s9 }
   0xb   : > { %p1163_p3 = por %p46_p2, %p45_p1  ;;  %s35_s19 = ssub.s32 %s1097_s13, %s1297_s16 }
   0xc   : > { %p52_p5 = scmp.eq.s32.totalorder %s675_s15, 0  ;;  %p36_p6 = scmp.eq.s32.totalorder %s35_s19, 0 }
   0xd   : > { %p895_p8 = scmp.lt.s32.totalorder %s1101_s14, 6  ;;  %s1181_s22 = sand.u32 1, %s1089_s11  }
   0xe   : > { %p1172_p7 = por %p52_p5, %p51_p4  ;;  %s837_s23 = sshll.u32 %s1097_s13, 4 }
   0xf   : > { %s1178_s21 = scalar_select %p36_p6, %s1089_s11, %s38_s17  }
  0x10   : > { %s678_s24 = sshll.u32 %s1181_s22, 5  ;;  %s138_s27 = scalar_lea.hbm %s1285_s0, %s837_s23 }
  0x11   : > { %s139_s28 = sshll.u32 %s138_s27, 4  ;;  %s133_s29 = scalar_lea.vmem [#allocation3], %s678_s24  ;;  %s140_s28 = int_to_ptr.hbm [resolvable:$true] %s139_s28 }
  0x12   : > { %s141_s30 = sshll.u32 %s133_s29, 4  ;;  %p1190_p9 = pnand %p895_p8, %p1163_p3  ;;  %s142_s30 = int_to_ptr.vmem [resolvable:$true] %s141_s30 }
  0x13   : > { %p684_p10 = scmp.ge.s32.totalorder %s1101_s14, 1  ;;  %s130_s4 = scalar_lea.sflag [#allocation4], %s1181_s22 }
  0x14   : > { %s1103_s5 = smov 1536   ;;  %s1104_s6 = smov 256  }
  0x15   : > { %s1105_s7 = smov 16   ;;  %p172_p11 = scmp.lt.s32.totalorder %s1101_s14, 7 }
  0x16   : > { %891 = dma.hbm_to_vmem [thread:$0]  (!%p1190_p9), %s140_s28, 512, %s142_s30, %s130_s4, %s1103_s5, %s1104_s6, %s1105_s7  }
  0x17   : > { %s681_s8 = sshll.u32 %s1181_s22, 8  ;;  %s838_s9 = sshll.u32 %s1097_s13, 8 }
  0x18   : > { %p173_p12 = pnand %p684_p10, %p172_p11  ;;  %s161_s19 = scalar_lea.hbm %s1286_s1, %s838_s9 }
  0x19   : > { %s155_s23 = scalar_lea.vmem [#allocation6], %s681_s8  ;;  %s162_s25 = sshll.u32 %s161_s19, 4  ;;  %s163_s25 = int_to_ptr.hbm [resolvable:$true] %s162_s25 }
  0x1a   : > { %s164_s24 = sshll.u32 %s155_s23, 4  ;;  %s152_s26 = scalar_lea.sflag [#allocation7], %s1181_s22  ;;  %s165_s24 = int_to_ptr.vmem [resolvable:$true] %s164_s24 }
  0x1b   : > { %s1106_s27 = smov 64   ;;  %s1107_s29 = smov 4  }
  0x1c   : > { %894 = dma.hbm_to_vmem [thread:$0]  (!%p1190_p9), %s163_s25, 4096, %s165_s24, %s152_s26, %s1106_s27, %s1106_s27, %s1107_s29  }
  0x1d   : > { %176 = sbr.rel (%p173_p12) target bundleno = 247 (0xf7), region = 28  ;;  %s178_s28 = sand.u32 (!%p173_p12), 1, %s1085_s10  }
  0x1e   : > { %s685_s30 = sshll.u32 (!%p173_p12), %s178_s28, 5  ;;  %s179_s4 = scalar_lea.sflag (!%p173_p12), [#allocation4], %s178_s28 }
  0x1f   : > { %s1208_s5 = scalar_lea.vmem (!%p173_p12), [#allocation3], %s685_s30 }
  0x22   : > { %1068 = dma.done.wait (%p1172_p7), %s179_s4, 512  }
  0x23   : > { %1070 = vsyncadd (%p1172_p7), %s179_s4, 4294966784  ;;  %s686_s6 = sshll.u32 %s178_s28, 8  ;;  %s189_s22 = scalar_lea.sflag [#allocation7], %s178_s28 }
  0x24   : > { %s1214_s7 = scalar_lea.vmem [#allocation6], %s686_s6 }
  0x25   : > { %1072 = dma.done.wait (%p1172_p7), %s189_s22, 4096  }
  0x26   : > { %1074 = vsyncadd (%p1172_p7), %s189_s22, 4294963200  ;;  %p687_p13 = scmp.ne.s32.totalorder %s1093_s12, 0 }
  0x28   : > { %219 = sbr.rel (%p687_p13) target bundleno = 48 (0x30), region = 40 }
  0x2d   : > { %v1108_v0 = vmov 0.0  }
  0x2e   : > { %220 = vst [vmem:[#allocation2] sm:$0xff] %v1108_v0 }
  0x2f   : > { %221 = vst [vmem:[#allocation2 + $0x8] sm:$0xff] %v1108_v0 }
  0x30 PF: > { %v850_v1 = vld [vmem:[%s1214_s7 + $0x38] sm:$0xff]  ;;  %v849_v5 = vld [vmem:[%s1214_s7 + $0x30] sm:$0xff]  ;;  %v848_v9 = vld [vmem:[%s1214_s7 + $0x28] sm:$0xff]  ;;  %p832_p0 = scmp.ne.s32.totalorder %s1093_s12, 5 }
  0x31   : > { %v858_v2 = vld [vmem:[%s1214_s7 + $0x78] sm:$0xff]  ;;  %504 = vmatpush.bf16.msra.mxu0 %v850_v1  ;;  %v857_v6 = vld [vmem:[%s1214_s7 + $0x70] sm:$0xff]  ;;  %v856_v10 = vld [vmem:[%s1214_s7 + $0x68] sm:$0xff] }
  0x32   : > { %v866_v3 = vld [vmem:[%s1214_s7 + $0xb8] sm:$0xff]  ;;  %518 = vmatpush.bf16.msra.mxu1 %v858_v2  ;;  %v865_v7 = vld [vmem:[%s1214_s7 + $0xb0] sm:$0xff]  ;;  %v864_v11 = vld [vmem:[%s1214_s7 + $0xa8] sm:$0xff] }
  0x33   : > { %v874_v4 = vld [vmem:[%s1214_s7 + $0xf8] sm:$0xff]  ;;  %532 = vmatpush.bf16.msra.mxu2 %v866_v3  ;;  %v873_v8 = vld [vmem:[%s1214_s7 + $0xf0] sm:$0xff]  ;;  %v872_v12 = vld [vmem:[%s1214_s7 + $0xe8] sm:$0xff] }
  0x34   : > { %546 = vmatpush.bf16.msra.mxu3 %v874_v4  ;;  %v847_v13 = vld [vmem:[%s1214_s7 + $0x20] sm:$0xff]  ;;  %v846_v17 = vld [vmem:[%s1214_s7 + $0x18] sm:$0xff]  ;;  %v845_v21 = vld [vmem:[%s1214_s7 + $0x10] sm:$0xff] }
  0x35   : > { %505 = vmatpush.bf16.msra.mxu0 %v849_v5  ;;  %v855_v14 = vld [vmem:[%s1214_s7 + $0x60] sm:$0xff]  ;;  %v854_v18 = vld [vmem:[%s1214_s7 + $0x58] sm:$0xff]  ;;  %v853_v22 = vld [vmem:[%s1214_s7 + $0x50] sm:$0xff] }
  0x36   : > { %519 = vmatpush.bf16.msra.mxu1 %v857_v6  ;;  %v863_v15 = vld [vmem:[%s1214_s7 + $0xa0] sm:$0xff]  ;;  %v862_v19 = vld [vmem:[%s1214_s7 + $0x98] sm:$0xff]  ;;  %v861_v23 = vld [vmem:[%s1214_s7 + $0x90] sm:$0xff] }
  0x37   : > { %533 = vmatpush.bf16.msra.mxu2 %v865_v7  ;;  %v871_v16 = vld [vmem:[%s1214_s7 + $0xe0] sm:$0xff]  ;;  %v870_v20 = vld [vmem:[%s1214_s7 + $0xd8] sm:$0xff]  ;;  %v869_v24 = vld [vmem:[%s1214_s7 + $0xd0] sm:$0xff] }
  0x38   : > { %547 = vmatpush.bf16.msra.mxu3 %v873_v8  ;;  %v844_v25 = vld [vmem:[%s1214_s7 + $0x8] sm:$0xff]  ;;  %v843_v29 = vld [vmem:[%s1214_s7] sm:$0xff]  ;;  %v841_v34 = vld [vmem:[%s1208_s5 + $0xc] sm:$0xf0] }
  0x39   : > { %506 = vmatpush.bf16.msra.mxu0 %v848_v9  ;;  %v852_v26 = vld [vmem:[%s1214_s7 + $0x48] sm:$0xff]  ;;  %v851_v30 = vld [vmem:[%s1214_s7 + $0x40] sm:$0xff]  ;;  %v692_v36 = vld [vmem:[%s1208_s5 + $0x10] sm:$0xf0] }
  0x3a   : > { %520 = vmatpush.bf16.msra.mxu1 %v856_v10  ;;  %v860_v27 = vld [vmem:[%s1214_s7 + $0x88] sm:$0xff]  ;;  %v859_v31 = vld [vmem:[%s1214_s7 + $0x80] sm:$0xff]  ;;  %v842_v38 = vld [vmem:[%s1208_s5 + $0x14] sm:$0xf0] }
  0x3b   : > { %534 = vmatpush.bf16.msra.mxu2 %v864_v11  ;;  %v868_v28 = vld [vmem:[%s1214_s7 + $0xc8] sm:$0xff]  ;;  %v867_v32 = vld [vmem:[%s1214_s7 + $0xc0] sm:$0xff]  ;;  %v700_v40 = vld [vmem:[%s1208_s5 + $0x18] sm:$0xf0] }
  0x3c   : > { %548 = vmatpush.bf16.msra.mxu3 %v872_v12  ;;  %v690_v33 = vld [vmem:[%s1208_s5] sm:$0xf]  ;;  %v839_v35 = vld [vmem:[%s1208_s5 + $0x4] sm:$0xf]  ;;  %v698_v37 = vld [vmem:[%s1208_s5 + $0x8] sm:$0xf] }
  0x3d   : > { %507 = vmatpush.bf16.msra.mxu0 %v847_v13  ;;  %v840_v39 = vld [vmem:[%s1208_s5 + $0xc] sm:$0xf]  ;;  %v691_v41 = vor.u32 %v841_v34, %v690_v33  ;;  %v695_v42 = vor.u32 %v839_v35, %v692_v36  ;;  %v699_v43 = vor.u32 %v842_v38, %v698_v37  ;;  %v222_v51 = vld [vmem:[#allocation2] sm:$0xff]  ;;  %v223_v59 = vld [vmem:[#allocation2 + $0x8] sm:$0xff] }
  0x3e   : > { %521 = vmatpush.bf16.msra.mxu1 %v855_v14  ;;  %v703_v44 = vor.u32 %v840_v39, %v700_v40 }
  0x3f   : > { %535 = vmatpush.bf16.msra.mxu2 %v863_v15 }
  0x40   : > { %549 = vmatpush.bf16.msra.mxu3 %v871_v16 }
  0x41   : > { %508 = vmatpush.bf16.msra.mxu0 %v846_v17 }
  0x42   : > { %522 = vmatpush.bf16.msra.mxu1 %v854_v18 }
  0x43   : > { %536 = vmatpush.bf16.msra.mxu2 %v862_v19 }
  0x44   : > { %550 = vmatpush.bf16.msra.mxu3 %v870_v20 }
  0x45   : > { %509 = vmatpush.bf16.msra.mxu0 %v845_v21 }
  0x46   : > { %523 = vmatpush.bf16.msra.mxu1 %v853_v22 }
  0x47   : > { %537 = vmatpush.bf16.msra.mxu2 %v861_v23 }
  0x48   : > { %551 = vmatpush.bf16.msra.mxu3 %v869_v24 }
  0x49   : > { %510 = vmatpush.bf16.msra.mxu0 %v844_v25 }
  0x4a   : > { %524 = vmatpush.bf16.msra.mxu1 %v852_v26 }
  0x4b   : > { %538 = vmatpush.bf16.msra.mxu2 %v860_v27 }
  0x4c   : > { %552 = vmatpush.bf16.msra.mxu3 %v868_v28 }
  0x4d   : > { %511 = vmatpush.bf16.msra.mxu0 %v843_v29 }
  0x4e   : > { %525 = vmatpush.bf16.msra.mxu1 %v851_v30 }
  0x4f   : > { %539 = vmatpush.bf16.msra.mxu2 %v859_v31 }
  0x50   : > { %553 = vmatpush.bf16.msra.mxu3 %v867_v32  ;;  %512 = vmatmul.bf16.vlgmr.msra.gmra.mxu0 %v691_v41 }
  0x51   : > { %526 = vmatmul.bf16.vlgmr.msra.gmra.mxu1 %v695_v42 }
  0x52   : > { %540 = vmatmul.bf16.vlgmr.msra.gmra.mxu2 %v699_v43 }
  0x53   : > { %554 = vmatmul.bf16.vlgmr.msra.gmra.mxu3 %v703_v44 }
  0xcd   : > { %v513_v45 = vpop.f32.mrf.mxu0 }
  0xce   : > { %v527_v46 = vpop.f32.mrf.mxu1 }
  0xcf   : > { %v528_v47 = vadd.f32 %v527_v46, %v513_v45 }
  0xd5   : > { %v541_v48 = vpop.f32.mrf.mxu2  ;;  %v515_v53 = vpop.f32.mrf.mxu0 }
  0xd6   : > { %v555_v49 = vpop.f32.mrf.mxu3  ;;  %v542_v50 = vadd.f32 %v541_v48, %v528_v47  ;;  %v529_v54 = vpop.f32.mrf.mxu1 }
  0xd7   : > { %v530_v56 = vadd.f32 %v529_v54, %v515_v53 }
  0xd8   : > { %v556_v52 = vadd.f32 %v555_v49, %v542_v50 }
  0xda   : > { %v560_v55 = vadd.f32 %v556_v52, %v222_v51 }
  0xdc   : > { %562 = vst [vmem:[#allocation2] sm:$0xff] %v560_v55 }
  0xdd   : > { %v543_v57 = vpop.f32.mrf.mxu2 }
  0xde   : > { %v544_v58 = vadd.f32 %v543_v57, %v530_v56  ;;  %v557_v60 = vpop.f32.mrf.mxu3 }
  0xe0   : > { %v558_v61 = vadd.f32 %v557_v60, %v544_v58  ;;  %567 = sbr.rel (%p832_p0) target bundleno = 241 (0xf1), region = 44 }
  0xe2   : > { %v561_v62 = vadd.f32 %v558_v61, %v223_v59 }
  0xe4   : > { %563 = vst [vmem:[#allocation2 + $0x8] sm:$0xff] %v561_v62 }
  0xe5   : > { %v568_v63 = vld [vmem:[#allocation2] sm:$0xff] }
  0xe6   : > { %v570_v1 = vmax.f32 %v568_v63, 0.0 }
  0xeb   : > { %v569_v0 = vld [vmem:[#allocation2 + $0x8] sm:$0xff] }
  0xec   : > { %v571_v2 = vmax.f32 %v569_v0, 0.0 }
  0xee   : > { %v878_v3 = vpack.c.bf16 %v571_v2, %v570_v1 }
  0xf0   : > { %879 = vst [vmem:[#allocation8] sm:$0xff] %v878_v3  }
  0xf1 PF: > { %p896_p1 = scmp.eq.s32.totalorder %s675_s15, 5  ;;  %s585_s8 = sshll.u32 %s1287_s2, 4  ;;  %s586_s8 = int_to_ptr.hbm [resolvable:$true] %s585_s8 }
  0xf2   : > { %s1109_s9 = smov [#allocation8]   ;;  %s1110_s12 = smov 64  }
  0xf3   : > { %s583_s17 = sshll.u32 %s1109_s9, 4  ;;  %s1111_s18 = smov 4   ;;  %s584_s17 = int_to_ptr.vmem [resolvable:$true] %s583_s17 }
  0xf4   : > { %885 = dma.vmem_to_hbm [thread:$0]  (%p896_p1), %s584_s17, 128, %s586_s8, [#allocation5], %s1110_s12, %s1110_s12, %s1111_s18  }
  0xf5   : > { %1076 = dma.done.wait (%p896_p1), [#allocation5], 128  }
  0xf6   : > { %1078 = vsyncadd (%p896_p1), [#allocation5], 4294967168 }
  0xf7 PF: > { %s19_s14 = sadd.s32 1, %s1101_s14   ;;  %s1291_s9 = smov %s1085_s10 }
  0xf8   : > { %p16_p2 = scmp.ge.s32.totalorder %s19_s14, 8   ;;  %s1292_s10 = smov %s1089_s11 }
  0xf9   : > { %s1293_s11 = smov %s1178_s21  ;;  %s1294_s12 = smov %s1097_s13 }
  0xfa   : > { %s1295_s13 = smov %s1297_s16  ;;  %18 = sbr.rel (!%p16_p2) target bundleno = 7 (0x7), region = 87 }
  0xff   :  { %602 = vsyncpa [#allocation4], 1 }
 0x100   :  { %604 = vsyncpa [#allocation4 + $0x1], 1 }
 0x101   :  { %605 = vsyncpa [#allocation7], 1 }
 0x102   :  { %607 = vsyncpa [#allocation7 + $0x1], 1 }
 0x103   :  { %608 = vsyncpa [#allocation5], 1 }
 0x104   :  { %610 = vsyncpa [#allocation5 + $0x1], 1 }

</bundles_post_ra>
